<compile_context>
chip_gen: v7x
topology: tpu7x:2x2x1
jax: 0.10.0
libtpu: 0.0.40
codegen_flags: <defaults>
</compile_context>

<pallas_src>
import functools

import jax
import jax.numpy as jnp
from jax.experimental import pallas as pl
from jax.experimental.pallas import tpu as pltpu


def _conv_kernel(x_ref, w_ref, o_ref, *, k, wp, c_in, c_out, bpg, lt):
    """One (batch-group, lane-tile) step.

    x_ref: (bpg, Cin, F)             reflection-padded images, rows flattened
    w_ref: (bpg*Cout, Cin*k*k + 1)   conv weights (+ bias in last column), tiled per image
    o_ref: (bpg, Cout, lt)           one 128-aligned lane tile of the flat Ho*Wp map
    """
    rows = bpg * c_out
    n_taps = c_in * k * k
    halo = (k - 1) * wp + (k - 1)                # largest static tap offset
    seg_len = lt + halo

    r = pl.program_id(1)
    base = pl.multiple_of(r * lt, 128)           # lane offset of this tile (lt % 128 == 0)

    wb = w_ref[...].astype(jnp.float32)          # (rows, n_taps + 1), ~1 vreg
    # Bias-initialised, lane-dense f32 accumulator with all bpg*Cout sublanes live.
    acc = jnp.broadcast_to(wb[:, n_taps:n_taps + 1], (rows, lt))

    for ci in range(c_in):
        # (bpg, seg_len) window of this channel's flattened rows for the current tile,
        # replicated across each image's Cout accumulator sublanes -> (bpg*Cout, seg_len).
        seg = x_ref[:, ci, pl.ds(base, seg_len)].astype(jnp.float32)
        rep = jnp.broadcast_to(seg[:, None, :], (bpg, c_out, seg_len)).reshape(rows, seg_len)
        for dy in range(k):
            for dx in range(k):
                s = dy * wp + dx                              # static lane offset
                t = (ci * k + dy) * k + dx
                acc = acc + wb[:, t:t + 1] * rep[:, s:s + lt]  # VPU broadcast-FMA

    for im in range(bpg):                                     # per-image (Cout, lt) store
        o_ref[im] = acc[im * c_out:(im + 1) * c_out, :].astype(o_ref.dtype)


def _round_up(x, m):
    return -(-x // m) * m


def _num_lane_tiles(n_lane_blocks, num_groups, max_lanes_per_tile=16384):
    """Split the padded output lanes into 128-aligned tiles.

    Keeps >=2 total grid steps when the batch axis alone has only one (feeds both
    TensorCores on v7x) and bounds the per-step output block size.
    """
    want = 2 if num_groups < 2 else 1
    want = max(want, -(-(n_lane_blocks * 128) // max_lanes_per_tile))
    want = min(want, n_lane_blocks)
    for t in range(want, n_lane_blocks + 1):
        if n_lane_blocks % t == 0:
            return t
    return n_lane_blocks


def synthesis_forward(x, weight, bias, *, k, stride=1):
    """Equivalent of Sysnthesis.forward.

    x:      (N, Cin, H, W)    NCHW input (consumed directly, no transpose)
    weight: (Cout, Cin, k, k) PyTorch Conv2d weight
    bias:   (Cout,)
    returns (N, Cout, Ho, Wo) NCHW output
    """
    pad = (k - 1) // 2
    n, c_in, h, w = x.shape
    c_out = weight.shape[0]
    assert h > pad and w > pad, "reflection pad requires pad < spatial size"

    hp, wp = h + 2 * pad, w + 2 * pad
    ho1, wo1 = hp - k + 1, wp - k + 1            # stride-1 output size (== h, w for odd k)
    acc_len = ho1 * wp                           # flattened stride-1 map (incl. junk cols)
    lpad = _round_up(acc_len, 128)               # lane-padded -> unmasked stores
    halo = (k - 1) * wp + (k - 1)

    # Images per grid step: fill 8 sublanes of the accumulator (bpg*Cout rows).
    bpg = 1
    for cand in range(min(max(1, 8 // c_out), n), 0, -1):
        if n % cand == 0:
            bpg = cand
            break
    num_groups = n // bpg

    n_lane_blocks = lpad // 128
    n_rt = _num_lane_tiles(n_lane_blocks, num_groups)
    lt = (n_lane_blocks // n_rt) * 128

    # Reflection pad (single XLA pad) + enough zero rows below so every length-lt tap
    # slice stays in bounds; those rows only ever feed lanes that are trimmed later.
    f_need = lpad + halo
    extra_rows = max(0, -(-(f_need - hp * wp) // wp))
    xp = jnp.pad(x, ((0, 0), (0, 0), (pad, pad), (pad, pad)), mode="reflect")
    if extra_rows:
        xp = jnp.pad(xp, ((0, 0), (0, 0), (0, extra_rows), (0, 0)))
    f = (hp + extra_rows) * wp
    xf = xp.reshape(n, c_in, f)                  # metadata-only reshape

    # Weights as lane-dense (bpg*Cout, Cin*k*k + 1), bias folded into the last column,
    # tiled once per packed image (row img*Cout + co holds weights of out-channel co).
    n_taps = c_in * k * k
    wb = jnp.concatenate(
        [weight.astype(jnp.float32).reshape(c_out, n_taps),
         bias.astype(jnp.float32).reshape(c_out, 1)], axis=1)
    wb = jnp.tile(wb, (bpg, 1))

    kernel = functools.partial(_conv_kernel, k=k, wp=wp, c_in=c_in, c_out=c_out,
                               bpg=bpg, lt=lt)

    out_flat = pl.pallas_call(
        kernel,
        out_shape=jax.ShapeDtypeStruct((n, c_out, lpad), x.dtype),
        grid_spec=pl.GridSpec(
            grid=(num_groups, n_rt),
            in_specs=[
                pl.BlockSpec((bpg, c_in, f), lambda g, r: (g, 0, 0)),
                pl.BlockSpec((bpg * c_out, n_taps + 1), lambda g, r: (0, 0)),
            ],
            out_specs=pl.BlockSpec((bpg, c_out, lt), lambda g, r: (g, 0, r)),
        ),
        compiler_params=pltpu.CompilerParams(
            dimension_semantics=("parallel", "parallel"),
            vmem_limit_bytes=32 * 1024 * 1024),
    )(xf, wb)

    # Trim: (N, Cout, lpad) -> valid stride-1 map (N, Cout, Ho, Wo).
    out = out_flat[:, :, :acc_len].reshape(n, c_out, ho1, wp)[:, :, :, :wo1]
    if stride > 1:
        # Matches Conv2d's output grid exactly; module default is stride=1.
        out = out[:, :, ::stride, ::stride]
    return out


if __name__ == "__main__":
    # Shapes consistent with the module: nFeat=Cin=4, nChannels=Cout=4, k=3, stride=1
    N, C_IN, C_OUT, H, W, K, STRIDE = 2, 4, 4, 16, 16, 3, 1

    key = jax.random.PRNGKey(0)
    kx, kw, kb = jax.random.split(key, 3)
    x = jax.random.normal(kx, (N, C_IN, H, W), dtype=jnp.float32)
    weight = jax.random.normal(kw, (C_OUT, C_IN, K, K), dtype=jnp.float32) * 0.1
    bias = jax.random.normal(kb, (C_OUT,), dtype=jnp.float32) * 0.1

    fwd = jax.jit(functools.partial(synthesis_forward, k=K, stride=STRIDE))
    out = jax.block_until_ready(fwd(x, weight, bias))

    # Reference: XLA conv on the reflection-padded input, full f32 precision.
    pad = (K - 1) // 2
    xp_ref = jnp.pad(x, ((0, 0), (0, 0), (pad, pad), (pad, pad)), mode="reflect")
    ref = jax.lax.conv_general_dilated(
        xp_ref, weight, window_strides=(STRIDE, STRIDE), padding="VALID",
        dimension_numbers=("NCHW", "OIHW", "NCHW"),
        precision=jax.lax.Precision.HIGHEST)
    ref = ref + bias.reshape(1, C_OUT, 1, 1)

    assert out.shape == (N, C_OUT, H, W)
    assert jnp.allclose(out, ref, atol=1e-4, rtol=1e-4)

    print("KERNEL_OK")
</pallas_src>

<mosaic_0001>
module attributes {stable_mosaic.version = 11 : i64} {
  func.func @_conv_kernel(%arg0: i32, %arg1: i32, %arg2: memref<2x4x432xf32, #tpu.memory_space<vmem>>, %arg3: memref<8x37xf32, #tpu.memory_space<vmem>>, %arg4: memref<2x4x128xf32, #tpu.memory_space<vmem>>) attributes {dimension_semantics = [#tpu.dimension_semantics<parallel>, #tpu.dimension_semantics<parallel>], iteration_bounds = array<i64: 1, 3>, scalar_prefetch = 0 : i64, scratch_operands = 0 : i64, tpu.core_type = #tpu.core_type<tc>, window_params = [{transform_indices = @transform_0, window_bounds = array<i64: 2, 4, 432>}, {pipeline_mode = #tpu.pipeline_mode<synchronous>, transform_indices = @transform_1, window_bounds = array<i64: 8, 37>}, {transform_indices = @transform_2, window_bounds = array<i64: 2, 4, 128>}]} {
    %c128_i32 = arith.constant 128 : i32
    %0 = arith.muli %arg1, %c128_i32 : i32
    %1 = tpu.assume_multiple %0, 128 : i32
    %c0 = arith.constant 0 : index
    %c0_0 = arith.constant 0 : index
    %2 = vector.load %arg3[%c0, %c0_0] : memref<8x37xf32, #tpu.memory_space<vmem>>, vector<8x37xf32>
    %3 = vector.extract_strided_slice %2 {offsets = [0, 36], sizes = [8, 1], strides = [1, 1]} : vector<8x37xf32> to vector<8x1xf32>
    %4 = vector.shape_cast %3 : vector<8x1xf32> to vector<8x1xf32>
    %5 = vector.broadcast %4 : vector<8x1xf32> to vector<8x128xf32>
    %c0_1 = arith.constant 0 : index
    %c0_2 = arith.constant 0 : index
    %6 = arith.index_cast %1 : i32 to index
    %7 = vector.load %arg2[%c0_1, %c0_2, %6] : memref<2x4x432xf32, #tpu.memory_space<vmem>>, vector<2x1x166xf32>
    %8 = vector.shape_cast %7 : vector<2x1x166xf32> to vector<2x166xf32>
    %9 = vector.shape_cast %8 : vector<2x166xf32> to vector<2x1x166xf32>
    %10 = vector.shape_cast %9 : vector<2x1x166xf32> to vector<2x1x166xf32>
    %11 = vector.broadcast %10 : vector<2x1x166xf32> to vector<2x4x166xf32>
    %12 = vector.shape_cast %11 : vector<2x4x166xf32> to vector<8x166xf32>
    %13 = vector.extract_strided_slice %2 {offsets = [0, 0], sizes = [8, 1], strides = [1, 1]} : vector<8x37xf32> to vector<8x1xf32>
    %14 = vector.extract_strided_slice %12 {offsets = [0, 0], sizes = [8, 128], strides = [1, 1]} : vector<8x166xf32> to vector<8x128xf32>
    %15 = vector.broadcast %13 : vector<8x1xf32> to vector<8x128xf32>
    %16 = arith.mulf %15, %14 : vector<8x128xf32>
    %17 = arith.addf %5, %16 : vector<8x128xf32>
    %18 = vector.extract_strided_slice %2 {offsets = [0, 1], sizes = [8, 1], strides = [1, 1]} : vector<8x37xf32> to vector<8x1xf32>
    %19 = vector.extract_strided_slice %12 {offsets = [0, 1], sizes = [8, 128], strides = [1, 1]} : vector<8x166xf32> to vector<8x128xf32>
    %20 = vector.broadcast %18 : vector<8x1xf32> to vector<8x128xf32>
    %21 = arith.mulf %20, %19 : vector<8x128xf32>
    %22 = arith.addf %17, %21 : vector<8x128xf32>
    %23 = vector.extract_strided_slice %2 {offsets = [0, 2], sizes = [8, 1], strides = [1, 1]} : vector<8x37xf32> to vector<8x1xf32>
    %24 = vector.extract_strided_slice %12 {offsets = [0, 2], sizes = [8, 128], strides = [1, 1]} : vector<8x166xf32> to vector<8x128xf32>
    %25 = vector.broadcast %23 : vector<8x1xf32> to vector<8x128xf32>
    %26 = arith.mulf %25, %24 : vector<8x128xf32>
    %27 = arith.addf %22, %26 : vector<8x128xf32>
    %28 = vector.extract_strided_slice %2 {offsets = [0, 3], sizes = [8, 1], strides = [1, 1]} : vector<8x37xf32> to vector<8x1xf32>
    %29 = vector.extract_strided_slice %12 {offsets = [0, 18], sizes = [8, 128], strides = [1, 1]} : vector<8x166xf32> to vector<8x128xf32>
    %30 = vector.broadcast %28 : vector<8x1xf32> to vector<8x128xf32>
    %31 = arith.mulf %30, %29 : vector<8x128xf32>
    %32 = arith.addf %27, %31 : vector<8x128xf32>
    %33 = vector.extract_strided_slice %2 {offsets = [0, 4], sizes = [8, 1], strides = [1, 1]} : vector<8x37xf32> to vector<8x1xf32>
    %34 = vector.extract_strided_slice %12 {offsets = [0, 19], sizes = [8, 128], strides = [1, 1]} : vector<8x166xf32> to vector<8x128xf32>
    %35 = vector.broadcast %33 : vector<8x1xf32> to vector<8x128xf32>
    %36 = arith.mulf %35, %34 : vector<8x128xf32>
    %37 = arith.addf %32, %36 : vector<8x128xf32>
    %38 = vector.extract_strided_slice %2 {offsets = [0, 5], sizes = [8, 1], strides = [1, 1]} : vector<8x37xf32> to vector<8x1xf32>
    %39 = vector.extract_strided_slice %12 {offsets = [0, 20], sizes = [8, 128], strides = [1, 1]} : vector<8x166xf32> to vector<8x128xf32>
    %40 = vector.broadcast %38 : vector<8x1xf32> to vector<8x128xf32>
    %41 = arith.mulf %40, %39 : vector<8x128xf32>
    %42 = arith.addf %37, %41 : vector<8x128xf32>
    %43 = vector.extract_strided_slice %2 {offsets = [0, 6], sizes = [8, 1], strides = [1, 1]} : vector<8x37xf32> to vector<8x1xf32>
    %44 = vector.extract_strided_slice %12 {offsets = [0, 36], sizes = [8, 128], strides = [1, 1]} : vector<8x166xf32> to vector<8x128xf32>
    %45 = vector.broadcast %43 : vector<8x1xf32> to vector<8x128xf32>
    %46 = arith.mulf %45, %44 : vector<8x128xf32>
    %47 = arith.addf %42, %46 : vector<8x128xf32>
    %48 = vector.extract_strided_slice %2 {offsets = [0, 7], sizes = [8, 1], strides = [1, 1]} : vector<8x37xf32> to vector<8x1xf32>
    %49 = vector.extract_strided_slice %12 {offsets = [0, 37], sizes = [8, 128], strides = [1, 1]} : vector<8x166xf32> to vector<8x128xf32>
    %50 = vector.broadcast %48 : vector<8x1xf32> to vector<8x128xf32>
    %51 = arith.mulf %50, %49 : vector<8x128xf32>
    %52 = arith.addf %47, %51 : vector<8x128xf32>
    %53 = vector.extract_strided_slice %2 {offsets = [0, 8], sizes = [8, 1], strides = [1, 1]} : vector<8x37xf32> to vector<8x1xf32>
    %54 = vector.extract_strided_slice %12 {offsets = [0, 38], sizes = [8, 128], strides = [1, 1]} : vector<8x166xf32> to vector<8x128xf32>
    %55 = vector.broadcast %53 : vector<8x1xf32> to vector<8x128xf32>
    %56 = arith.mulf %55, %54 : vector<8x128xf32>
    %57 = arith.addf %52, %56 : vector<8x128xf32>
    %c0_3 = arith.constant 0 : index
    %c1 = arith.constant 1 : index
    %58 = arith.index_cast %1 : i32 to index
    %59 = vector.load %arg2[%c0_3, %c1, %58] : memref<2x4x432xf32, #tpu.memory_space<vmem>>, vector<2x1x166xf32>
    %60 = vector.shape_cast %59 : vector<2x1x166xf32> to vector<2x166xf32>
    %61 = vector.shape_cast %60 : vector<2x166xf32> to vector<2x1x166xf32>
    %62 = vector.shape_cast %61 : vector<2x1x166xf32> to vector<2x1x166xf32>
    %63 = vector.broadcast %62 : vector<2x1x166xf32> to vector<2x4x166xf32>
    %64 = vector.shape_cast %63 : vector<2x4x166xf32> to vector<8x166xf32>
    %65 = vector.extract_strided_slice %2 {offsets = [0, 9], sizes = [8, 1], strides = [1, 1]} : vector<8x37xf32> to vector<8x1xf32>
    %66 = vector.extract_strided_slice %64 {offsets = [0, 0], sizes = [8, 128], strides = [1, 1]} : vector<8x166xf32> to vector<8x128xf32>
    %67 = vector.broadcast %65 : vector<8x1xf32> to vector<8x128xf32>
    %68 = arith.mulf %67, %66 : vector<8x128xf32>
    %69 = arith.addf %57, %68 : vector<8x128xf32>
    %70 = vector.extract_strided_slice %2 {offsets = [0, 10], sizes = [8, 1], strides = [1, 1]} : vector<8x37xf32> to vector<8x1xf32>
    %71 = vector.extract_strided_slice %64 {offsets = [0, 1], sizes = [8, 128], strides = [1, 1]} : vector<8x166xf32> to vector<8x128xf32>
    %72 = vector.broadcast %70 : vector<8x1xf32> to vector<8x128xf32>
    %73 = arith.mulf %72, %71 : vector<8x128xf32>
    %74 = arith.addf %69, %73 : vector<8x128xf32>
    %75 = vector.extract_strided_slice %2 {offsets = [0, 11], sizes = [8, 1], strides = [1, 1]} : vector<8x37xf32> to vector<8x1xf32>
    %76 = vector.extract_strided_slice %64 {offsets = [0, 2], sizes = [8, 128], strides = [1, 1]} : vector<8x166xf32> to vector<8x128xf32>
    %77 = vector.broadcast %75 : vector<8x1xf32> to vector<8x128xf32>
    %78 = arith.mulf %77, %76 : vector<8x128xf32>
    %79 = arith.addf %74, %78 : vector<8x128xf32>
    %80 = vector.extract_strided_slice %2 {offsets = [0, 12], sizes = [8, 1], strides = [1, 1]} : vector<8x37xf32> to vector<8x1xf32>
    %81 = vector.extract_strided_slice %64 {offsets = [0, 18], sizes = [8, 128], strides = [1, 1]} : vector<8x166xf32> to vector<8x128xf32>
    %82 = vector.broadcast %80 : vector<8x1xf32> to vector<8x128xf32>
    %83 = arith.mulf %82, %81 : vector<8x128xf32>
    %84 = arith.addf %79, %83 : vector<8x128xf32>
    %85 = vector.extract_strided_slice %2 {offsets = [0, 13], sizes = [8, 1], strides = [1, 1]} : vector<8x37xf32> to vector<8x1xf32>
    %86 = vector.extract_strided_slice %64 {offsets = [0, 19], sizes = [8, 128], strides = [1, 1]} : vector<8x166xf32> to vector<8x128xf32>
    %87 = vector.broadcast %85 : vector<8x1xf32> to vector<8x128xf32>
    %88 = arith.mulf %87, %86 : vector<8x128xf32>
    %89 = arith.addf %84, %88 : vector<8x128xf32>
    %90 = vector.extract_strided_slice %2 {offsets = [0, 14], sizes = [8, 1], strides = [1, 1]} : vector<8x37xf32> to vector<8x1xf32>
    %91 = vector.extract_strided_slice %64 {offsets = [0, 20], sizes = [8, 128], strides = [1, 1]} : vector<8x166xf32> to vector<8x128xf32>
    %92 = vector.broadcast %90 : vector<8x1xf32> to vector<8x128xf32>
    %93 = arith.mulf %92, %91 : vector<8x128xf32>
    %94 = arith.addf %89, %93 : vector<8x128xf32>
    %95 = vector.extract_strided_slice %2 {offsets = [0, 15], sizes = [8, 1], strides = [1, 1]} : vector<8x37xf32> to vector<8x1xf32>
    %96 = vector.extract_strided_slice %64 {offsets = [0, 36], sizes = [8, 128], strides = [1, 1]} : vector<8x166xf32> to vector<8x128xf32>
    %97 = vector.broadcast %95 : vector<8x1xf32> to vector<8x128xf32>
    %98 = arith.mulf %97, %96 : vector<8x128xf32>
    %99 = arith.addf %94, %98 : vector<8x128xf32>
    %100 = vector.extract_strided_slice %2 {offsets = [0, 16], sizes = [8, 1], strides = [1, 1]} : vector<8x37xf32> to vector<8x1xf32>
    %101 = vector.extract_strided_slice %64 {offsets = [0, 37], sizes = [8, 128], strides = [1, 1]} : vector<8x166xf32> to vector<8x128xf32>
    %102 = vector.broadcast %100 : vector<8x1xf32> to vector<8x128xf32>
    %103 = arith.mulf %102, %101 : vector<8x128xf32>
    %104 = arith.addf %99, %103 : vector<8x128xf32>
    %105 = vector.extract_strided_slice %2 {offsets = [0, 17], sizes = [8, 1], strides = [1, 1]} : vector<8x37xf32> to vector<8x1xf32>
    %106 = vector.extract_strided_slice %64 {offsets = [0, 38], sizes = [8, 128], strides = [1, 1]} : vector<8x166xf32> to vector<8x128xf32>
    %107 = vector.broadcast %105 : vector<8x1xf32> to vector<8x128xf32>
    %108 = arith.mulf %107, %106 : vector<8x128xf32>
    %109 = arith.addf %104, %108 : vector<8x128xf32>
    %c0_4 = arith.constant 0 : index
    %c2 = arith.constant 2 : index
    %110 = arith.index_cast %1 : i32 to index
    %111 = vector.load %arg2[%c0_4, %c2, %110] : memref<2x4x432xf32, #tpu.memory_space<vmem>>, vector<2x1x166xf32>
    %112 = vector.shape_cast %111 : vector<2x1x166xf32> to vector<2x166xf32>
    %113 = vector.shape_cast %112 : vector<2x166xf32> to vector<2x1x166xf32>
    %114 = vector.shape_cast %113 : vector<2x1x166xf32> to vector<2x1x166xf32>
    %115 = vector.broadcast %114 : vector<2x1x166xf32> to vector<2x4x166xf32>
    %116 = vector.shape_cast %115 : vector<2x4x166xf32> to vector<8x166xf32>
    %117 = vector.extract_strided_slice %2 {offsets = [0, 18], sizes = [8, 1], strides = [1, 1]} : vector<8x37xf32> to vector<8x1xf32>
    %118 = vector.extract_strided_slice %116 {offsets = [0, 0], sizes = [8, 128], strides = [1, 1]} : vector<8x166xf32> to vector<8x128xf32>
    %119 = vector.broadcast %117 : vector<8x1xf32> to vector<8x128xf32>
    %120 = arith.mulf %119, %118 : vector<8x128xf32>
    %121 = arith.addf %109, %120 : vector<8x128xf32>
    %122 = vector.extract_strided_slice %2 {offsets = [0, 19], sizes = [8, 1], strides = [1, 1]} : vector<8x37xf32> to vector<8x1xf32>
    %123 = vector.extract_strided_slice %116 {offsets = [0, 1], sizes = [8, 128], strides = [1, 1]} : vector<8x166xf32> to vector<8x128xf32>
    %124 = vector.broadcast %122 : vector<8x1xf32> to vector<8x128xf32>
    %125 = arith.mulf %124, %123 : vector<8x128xf32>
    %126 = arith.addf %121, %125 : vector<8x128xf32>
    %127 = vector.extract_strided_slice %2 {offsets = [0, 20], sizes = [8, 1], strides = [1, 1]} : vector<8x37xf32> to vector<8x1xf32>
    %128 = vector.extract_strided_slice %116 {offsets = [0, 2], sizes = [8, 128], strides = [1, 1]} : vector<8x166xf32> to vector<8x128xf32>
    %129 = vector.broadcast %127 : vector<8x1xf32> to vector<8x128xf32>
    %130 = arith.mulf %129, %128 : vector<8x128xf32>
    %131 = arith.addf %126, %130 : vector<8x128xf32>
    %132 = vector.extract_strided_slice %2 {offsets = [0, 21], sizes = [8, 1], strides = [1, 1]} : vector<8x37xf32> to vector<8x1xf32>
    %133 = vector.extract_strided_slice %116 {offsets = [0, 18], sizes = [8, 128], strides = [1, 1]} : vector<8x166xf32> to vector<8x128xf32>
    %134 = vector.broadcast %132 : vector<8x1xf32> to vector<8x128xf32>
    %135 = arith.mulf %134, %133 : vector<8x128xf32>
    %136 = arith.addf %131, %135 : vector<8x128xf32>
    %137 = vector.extract_strided_slice %2 {offsets = [0, 22], sizes = [8, 1], strides = [1, 1]} : vector<8x37xf32> to vector<8x1xf32>
    %138 = vector.extract_strided_slice %116 {offsets = [0, 19], sizes = [8, 128], strides = [1, 1]} : vector<8x166xf32> to vector<8x128xf32>
    %139 = vector.broadcast %137 : vector<8x1xf32> to vector<8x128xf32>
    %140 = arith.mulf %139, %138 : vector<8x128xf32>
    %141 = arith.addf %136, %140 : vector<8x128xf32>
    %142 = vector.extract_strided_slice %2 {offsets = [0, 23], sizes = [8, 1], strides = [1, 1]} : vector<8x37xf32> to vector<8x1xf32>
    %143 = vector.extract_strided_slice %116 {offsets = [0, 20], sizes = [8, 128], strides = [1, 1]} : vector<8x166xf32> to vector<8x128xf32>
    %144 = vector.broadcast %142 : vector<8x1xf32> to vector<8x128xf32>
    %145 = arith.mulf %144, %143 : vector<8x128xf32>
    %146 = arith.addf %141, %145 : vector<8x128xf32>
    %147 = vector.extract_strided_slice %2 {offsets = [0, 24], sizes = [8, 1], strides = [1, 1]} : vector<8x37xf32> to vector<8x1xf32>
    %148 = vector.extract_strided_slice %116 {offsets = [0, 36], sizes = [8, 128], strides = [1, 1]} : vector<8x166xf32> to vector<8x128xf32>
    %149 = vector.broadcast %147 : vector<8x1xf32> to vector<8x128xf32>
    %150 = arith.mulf %149, %148 : vector<8x128xf32>
    %151 = arith.addf %146, %150 : vector<8x128xf32>
    %152 = vector.extract_strided_slice %2 {offsets = [0, 25], sizes = [8, 1], strides = [1, 1]} : vector<8x37xf32> to vector<8x1xf32>
    %153 = vector.extract_strided_slice %116 {offsets = [0, 37], sizes = [8, 128], strides = [1, 1]} : vector<8x166xf32> to vector<8x128xf32>
    %154 = vector.broadcast %152 : vector<8x1xf32> to vector<8x128xf32>
    %155 = arith.mulf %154, %153 : vector<8x128xf32>
    %156 = arith.addf %151, %155 : vector<8x128xf32>
    %157 = vector.extract_strided_slice %2 {offsets = [0, 26], sizes = [8, 1], strides = [1, 1]} : vector<8x37xf32> to vector<8x1xf32>
    %158 = vector.extract_strided_slice %116 {offsets = [0, 38], sizes = [8, 128], strides = [1, 1]} : vector<8x166xf32> to vector<8x128xf32>
    %159 = vector.broadcast %157 : vector<8x1xf32> to vector<8x128xf32>
    %160 = arith.mulf %159, %158 : vector<8x128xf32>
    %161 = arith.addf %156, %160 : vector<8x128xf32>
    %c0_5 = arith.constant 0 : index
    %c3 = arith.constant 3 : index
    %162 = arith.index_cast %1 : i32 to index
    %163 = vector.load %arg2[%c0_5, %c3, %162] : memref<2x4x432xf32, #tpu.memory_space<vmem>>, vector<2x1x166xf32>
    %164 = vector.shape_cast %163 : vector<2x1x166xf32> to vector<2x166xf32>
    %165 = vector.shape_cast %164 : vector<2x166xf32> to vector<2x1x166xf32>
    %166 = vector.shape_cast %165 : vector<2x1x166xf32> to vector<2x1x166xf32>
    %167 = vector.broadcast %166 : vector<2x1x166xf32> to vector<2x4x166xf32>
    %168 = vector.shape_cast %167 : vector<2x4x166xf32> to vector<8x166xf32>
    %169 = vector.extract_strided_slice %2 {offsets = [0, 27], sizes = [8, 1], strides = [1, 1]} : vector<8x37xf32> to vector<8x1xf32>
    %170 = vector.extract_strided_slice %168 {offsets = [0, 0], sizes = [8, 128], strides = [1, 1]} : vector<8x166xf32> to vector<8x128xf32>
    %171 = vector.broadcast %169 : vector<8x1xf32> to vector<8x128xf32>
    %172 = arith.mulf %171, %170 : vector<8x128xf32>
    %173 = arith.addf %161, %172 : vector<8x128xf32>
    %174 = vector.extract_strided_slice %2 {offsets = [0, 28], sizes = [8, 1], strides = [1, 1]} : vector<8x37xf32> to vector<8x1xf32>
    %175 = vector.extract_strided_slice %168 {offsets = [0, 1], sizes = [8, 128], strides = [1, 1]} : vector<8x166xf32> to vector<8x128xf32>
    %176 = vector.broadcast %174 : vector<8x1xf32> to vector<8x128xf32>
    %177 = arith.mulf %176, %175 : vector<8x128xf32>
    %178 = arith.addf %173, %177 : vector<8x128xf32>
    %179 = vector.extract_strided_slice %2 {offsets = [0, 29], sizes = [8, 1], strides = [1, 1]} : vector<8x37xf32> to vector<8x1xf32>
    %180 = vector.extract_strided_slice %168 {offsets = [0, 2], sizes = [8, 128], strides = [1, 1]} : vector<8x166xf32> to vector<8x128xf32>
    %181 = vector.broadcast %179 : vector<8x1xf32> to vector<8x128xf32>
    %182 = arith.mulf %181, %180 : vector<8x128xf32>
    %183 = arith.addf %178, %182 : vector<8x128xf32>
    %184 = vector.extract_strided_slice %2 {offsets = [0, 30], sizes = [8, 1], strides = [1, 1]} : vector<8x37xf32> to vector<8x1xf32>
    %185 = vector.extract_strided_slice %168 {offsets = [0, 18], sizes = [8, 128], strides = [1, 1]} : vector<8x166xf32> to vector<8x128xf32>
    %186 = vector.broadcast %184 : vector<8x1xf32> to vector<8x128xf32>
    %187 = arith.mulf %186, %185 : vector<8x128xf32>
    %188 = arith.addf %183, %187 : vector<8x128xf32>
    %189 = vector.extract_strided_slice %2 {offsets = [0, 31], sizes = [8, 1], strides = [1, 1]} : vector<8x37xf32> to vector<8x1xf32>
    %190 = vector.extract_strided_slice %168 {offsets = [0, 19], sizes = [8, 128], strides = [1, 1]} : vector<8x166xf32> to vector<8x128xf32>
    %191 = vector.broadcast %189 : vector<8x1xf32> to vector<8x128xf32>
    %192 = arith.mulf %191, %190 : vector<8x128xf32>
    %193 = arith.addf %188, %192 : vector<8x128xf32>
    %194 = vector.extract_strided_slice %2 {offsets = [0, 32], sizes = [8, 1], strides = [1, 1]} : vector<8x37xf32> to vector<8x1xf32>
    %195 = vector.extract_strided_slice %168 {offsets = [0, 20], sizes = [8, 128], strides = [1, 1]} : vector<8x166xf32> to vector<8x128xf32>
    %196 = vector.broadcast %194 : vector<8x1xf32> to vector<8x128xf32>
    %197 = arith.mulf %196, %195 : vector<8x128xf32>
    %198 = arith.addf %193, %197 : vector<8x128xf32>
    %199 = vector.extract_strided_slice %2 {offsets = [0, 33], sizes = [8, 1], strides = [1, 1]} : vector<8x37xf32> to vector<8x1xf32>
    %200 = vector.extract_strided_slice %168 {offsets = [0, 36], sizes = [8, 128], strides = [1, 1]} : vector<8x166xf32> to vector<8x128xf32>
    %201 = vector.broadcast %199 : vector<8x1xf32> to vector<8x128xf32>
    %202 = arith.mulf %201, %200 : vector<8x128xf32>
    %203 = arith.addf %198, %202 : vector<8x128xf32>
    %204 = vector.extract_strided_slice %2 {offsets = [0, 34], sizes = [8, 1], strides = [1, 1]} : vector<8x37xf32> to vector<8x1xf32>
    %205 = vector.extract_strided_slice %168 {offsets = [0, 37], sizes = [8, 128], strides = [1, 1]} : vector<8x166xf32> to vector<8x128xf32>
    %206 = vector.broadcast %204 : vector<8x1xf32> to vector<8x128xf32>
    %207 = arith.mulf %206, %205 : vector<8x128xf32>
    %208 = arith.addf %203, %207 : vector<8x128xf32>
    %209 = vector.extract_strided_slice %2 {offsets = [0, 35], sizes = [8, 1], strides = [1, 1]} : vector<8x37xf32> to vector<8x1xf32>
    %210 = vector.extract_strided_slice %168 {offsets = [0, 38], sizes = [8, 128], strides = [1, 1]} : vector<8x166xf32> to vector<8x128xf32>
    %211 = vector.broadcast %209 : vector<8x1xf32> to vector<8x128xf32>
    %212 = arith.mulf %211, %210 : vector<8x128xf32>
    %213 = arith.addf %208, %212 : vector<8x128xf32>
    %214 = vector.extract_strided_slice %213 {offsets = [0, 0], sizes = [4, 128], strides = [1, 1]} : vector<8x128xf32> to vector<4x128xf32>
    %c0_6 = arith.constant 0 : index
    %c0_7 = arith.constant 0 : index
    %c0_8 = arith.constant 0 : index
    %215 = vector.load %arg4[%c0_6, %c0_7, %c0_8] : memref<2x4x128xf32, #tpu.memory_space<vmem>>, vector<1x4x128xf32>
    %216 = vector.shape_cast %215 : vector<1x4x128xf32> to vector<4x128xf32>
    %217 = vector.shape_cast %214 : vector<4x128xf32> to vector<1x4x128xf32>
    tpu.vector_store %arg4[%c0_6, %c0_7, %c0_8], %217 {strides = array<i32>} : memref<2x4x128xf32, #tpu.memory_space<vmem>>, vector<1x4x128xf32>,
    %218 = vector.extract_strided_slice %213 {offsets = [4, 0], sizes = [4, 128], strides = [1, 1]} : vector<8x128xf32> to vector<4x128xf32>
    %c1_9 = arith.constant 1 : index
    %c0_10 = arith.constant 0 : index
    %c0_11 = arith.constant 0 : index
    %219 = vector.load %arg4[%c1_9, %c0_10, %c0_11] : memref<2x4x128xf32, #tpu.memory_space<vmem>>, vector<1x4x128xf32>
    %220 = vector.shape_cast %219 : vector<1x4x128xf32> to vector<4x128xf32>
    %221 = vector.shape_cast %218 : vector<4x128xf32> to vector<1x4x128xf32>
    tpu.vector_store %arg4[%c1_9, %c0_10, %c0_11], %221 {strides = array<i32>} : memref<2x4x128xf32, #tpu.memory_space<vmem>>, vector<1x4x128xf32>,
    return
  }
  func.func @transform_0(%arg0: i32, %arg1: i32) -> (i32, i32, i32) {
    %c0_i32 = arith.constant 0 : i32
    %c0_i32_0 = arith.constant 0 : i32
    %c0_i32_1 = arith.constant 0 : i32
    return %arg0, %c0_i32, %c0_i32_0 : i32, i32, i32
  }
  func.func @transform_1(%arg0: i32, %arg1: i32) -> (i32, i32) {
    %c0_i32 = arith.constant 0 : i32
    %c0_i32_0 = arith.constant 0 : i32
    %c0_i32_1 = arith.constant 0 : i32
    return %c0_i32, %c0_i32_0 : i32, i32
  }
  func.func @transform_2(%arg0: i32, %arg1: i32) -> (i32, i32, i32) {
    %c0_i32 = arith.constant 0 : i32
    %c0_i32_0 = arith.constant 0 : i32
    return %arg0, %c0_i32, %arg1 : i32, i32, i32
  }
}

</mosaic_0001>

<bundles_post_ra>
// kernel: synthesis_forward.1
= control target key start
LH: loop header
LB: loop body
LE: loop exit
PB: predicated region body
PF: predicated region fallthrough
CT: control target
= control target key end

     0   :  { %s1066_s9 = smov 0   ;;  %s1068_s10 = smov 0   ;;  %s1387_s0 = inlined_call_operand.vmem [shape: f32[2,4,432], index: 0, kind: input, shape index: {}]   ;;  %s1388_s1 = inlined_call_operand.vmem [shape: f32[8,37], index: 1, kind: input, shape index: {}]   ;;  %s1389_s2 = inlined_call_operand.vmem [shape: f32[2,4,384], index: 2, kind: output, shape index: {}]  }
   0x1   :  { %s1070_s11 = smov 0   ;;  %s1072_s12 = smov 0  }
   0x2   :  { %s1074_s13 = smov 0  }
   0x3 LB: > { %s816_s14 = sadd.s32 4294967295, %s1004_s13   ;;  %s21_s15 = sadd.s32 1, %s1000_s12  ;;  %s1004_s13 = sphi %s1074_s13, %s12_s13   ;;  %s1000_s12 = sphi %s1072_s12, %s1394_s12   ;;  %s996_s11 = sphi %s1070_s11, %s1393_s11   ;;  %s992_s10 = sphi %s1068_s10, %s1392_s10   ;;  %s988_s9 = sphi %s1066_s9, %s1391_s9  }
   0x4   : > { %p22_p0 = scmp.ge.s32.totalorder %s21_s15, 3  ;;  %s80_s16 = sadd.s32 1, %s992_s10 }
   0x5   : > { %p90_p1 = scmp.ne.s32.totalorder %s992_s10, %s988_s9  ;;  %p91_p2 = scmp.eq.s32.totalorder %s816_s14, 2 }
   0x6   : > { %s1396_s15 = smov (%p22_p0, %s21_s15), 0  ;;  %p820_p4 = scmp.ge.s32.totalorder %s1004_s13, 1 }
   0x7   : > { %p1098_p3 = por %p91_p2, %p90_p1  ;;  %s76_s18 = ssub.s32 %s1000_s12, %s1396_s15 }
   0x8   : > { %p128_p5 = scmp.lt.s32.totalorder %s1004_s13, 4  ;;  %p78_p6 = scmp.eq.s32.totalorder %s76_s18, 0 }
   0xa   : > { %p129_p7 = pnand %p820_p4, %p128_p5 }
   0xb   : > { %s1107_s19 = scalar_select %p78_p6, %s992_s10, %s80_s16  }
   0xc   : > { %132 = sbr.rel (%p129_p7) target bundleno = 414 (0x19e), region = 28  ;;  %v1112_v0 = vld [vmem:[%s1388_s1] sm:$0xff] (!%p129_p7)  ;;  %s822_s22 = sshll.u32 (!%p129_p7), %s996_s11, 7  ;;  %v174_v1 = vlaneseq (!%p129_p7)  ;;  %v1006_v2 = vmov (!%p129_p7), 1   ;;  %v1007_v3 = vmov (!%p129_p7), 36   ;;  %v1008_v9 = vmov (!%p129_p7), 0  }
   0xd   : > { %931 = vset.pattern.permute.xlu1 (!%p129_p7), %v1006_v2  ;;  %929 = vset.pattern.permute.xlu0 (!%p129_p7), %v1007_v3  ;;  %s165_s23 = sshra.s32 (!%p129_p7), %s822_s22, 7  ;;  %v1009_v10 = vmov (!%p129_p7), 10   ;;  %s1010_s28 = smov (!%p129_p7), 127   ;;  %v1011_v17 = vmov (!%p129_p7), 2   ;;  %v1012_v18 = vmov (!%p129_p7), 3   ;;  %v1014_v19 = vmov (!%p129_p7), 4  }
   0xe   : > { %201 = vperm.xlu1 (!%p129_p7), %931, %v1112_v0   ;;  %162 = vperm.xlu0 (!%p129_p7), %929, %v1112_v0   ;;  %s823_s24 = sshll.u32 (!%p129_p7), %s165_s23, 2  ;;  %v175_v4 = vshrl.u32 (!%p129_p7), %v174_v1, 7  ;;  %s1013_s29 = smov (!%p129_p7), 126   ;;  %v1015_v20 = vmov (!%p129_p7), 5   ;;  %v1017_v21 = vmov (!%p129_p7), 6   ;;  %v1019_v22 = vmov (!%p129_p7), 7  }
   0xf   : > { %s1120_s27 = scalar_lea.vmem (!%p129_p7), %s1387_s0, %s823_s24  ;;  %s1016_s30 = smov (!%p129_p7), 110   ;;  %v1020_v23 = vmov (!%p129_p7), 8   ;;  %v1022_v28 = vmov (!%p129_p7), 9   ;;  %v1024_v32 = vmov (!%p129_p7), 12   ;;  %v1026_v34 = vmov (!%p129_p7), 13  }
  0x10   : > { %v169_v5 = vld [vmem:[%s1120_s27] ss:$4 sm:$0x3] (!%p129_p7)  ;;  %v824_v6 = vld [vmem:[%s1120_s27 + $0x10] ss:$4 sm:$0x3] (!%p129_p7) }
  0x11   : > { %v1124_v7 = vsub.s32 (!%p129_p7), 0, %v175_v4  ;;  %v1126_v8 = vsub.s32 (!%p129_p7), 1, %v175_v4  ;;  %s1018_s3 = smov (!%p129_p7), 109   ;;  %v827_v24 = vld [vmem:[%s1120_s27 + $0x1] ss:$4 sm:$0x3] (!%p129_p7) }
  0x12   : > { %930 = vset.pattern.permute.xlu0 (!%p129_p7), %v1008_v9  ;;  %940 = vset.pattern.permute.xlu1 (!%p129_p7), %v1009_v10  ;;  %v828_v25 = vld [vmem:[%s1120_s27 + $0x11] ss:$4 sm:$0x3] (!%p129_p7)  ;;  %s1021_s4 = smov (!%p129_p7), 108   ;;  %s1023_s5 = smov (!%p129_p7), 92   ;;  %v1028_v35 = vmov (!%p129_p7), 14  }
  0x13   : > { %193 = vperm.xlu0 %930, %v1112_v0   ;;  %v177_v11 = vrot.slane %v169_v5, %v1124_v7  ;;  %v185_v12 = vrot.slane %v824_v6, %v1124_v7  ;;  %v181_v13 = vrot.slane %v169_v5, %v1126_v8  ;;  %v189_v14 = vrot.slane %v824_v6, %v1126_v8  ;;  %s1025_s6 = smov 91   ;;  %s1027_s7 = smov 90   ;;  %v831_v40 = vld [vmem:[%s1120_s27 + $0x2] ss:$4 sm:$0x3] }
  0x14   : > { %v318_v26 = vrot.slane %v827_v24, %v1126_v8  ;;  %v326_v27 = vrot.slane %v828_v25, %v1126_v8  ;;  %v314_v30 = vrot.slane %v827_v24, %v1124_v7  ;;  %v322_v31 = vrot.slane %v828_v25, %v1124_v7  ;;  %v832_v41 = vld [vmem:[%s1120_s27 + $0x12] ss:$4 sm:$0x3]  ;;  %v835_v58 = vld [vmem:[%s1120_s27 + $0x3] ss:$4 sm:$0x3] }
  0x15   : > { %v1133_v15 = vcombine.low %v177_v11, %v185_v12  ;;  %v1137_v16 = vcombine.low %v181_v13, %v189_v14  ;;  %v1029_v36 = vmov 15   ;;  %v1030_v37 = vmov 16   ;;  %v836_v59 = vld [vmem:[%s1120_s27 + $0x13] ss:$4 sm:$0x3]  ;;  %s147_s8 = sand.u32 1, %s988_s9  }
  0x16   : > { %v1169_v29 = vcombine.low %v318_v26, %v326_v27  ;;  %v1177_v33 = vcombine.low %v314_v30, %v322_v31  ;;  %v1031_v38 = vmov 11   ;;  %v1032_v39 = vmov 17   ;;  %s821_s14 = sshll.u32 %s147_s8, 3  ;;  %s841_s18 = sshll.u32 (%p1098_p3), %s996_s11, 2 }
  0x17   : > { %205 = vrot.lane.b32.xlu1 %v1133_v15, %s1010_s28  ;;  %932 = vset.pattern.permute.xlu0 %v1011_v17  ;;  %v447_v42 = vrot.slane %v831_v40, %v1126_v8  ;;  %v455_v43 = vrot.slane %v832_v41, %v1126_v8  ;;  %v1033_v44 = vmov 18   ;;  %v1034_v45 = vmov 19   ;;  %s149_s16 = scalar_lea.vmem [#allocation2], %s821_s14  ;;  %s706_s21 = scalar_lea.vmem (%p1098_p3), %s1389_s2, %s841_s18 }
  0x18   : > { %215 = vperm.xlu0 %932, %v1112_v0   ;;  %v443_v47 = vrot.slane %v831_v40, %v1124_v7  ;;  %v451_v48 = vrot.slane %v832_v41, %v1124_v7  ;;  %v1035_v49 = vmov 21   ;;  %v1036_v51 = vmov 22  }
  0x19   : > { %v1208_v46 = vcombine.low %v447_v42, %v455_v43  ;;  %v1037_v52 = vmov 23   ;;  %v1038_v53 = vmov 24   ;;  %v1039_v54 = vmov 27  }
  0x1a   : > { %v1218_v50 = vcombine.low %v443_v47, %v451_v48  ;;  %v1040_v55 = vmov 28   ;;  %v576_v60 = vrot.slane %v835_v58, %v1126_v8  ;;  %v584_v61 = vrot.slane %v836_v59, %v1126_v8 }
  0x1b   : > { %207 = vrot.lane.b32.xlu1 %v1137_v16, %s1010_s28  ;;  %v1041_v63 = vmov 29   ;;  %v572_v4 = vrot.slane %v835_v58, %v1124_v7  ;;  %v580_v5 = vrot.slane %v836_v59, %v1124_v7  ;;  %vm209_vm0 = vcmask 1039360  }
  0x1c   : > { %933 = vset.pattern.permute.xlu0 %v1012_v18  ;;  %v1253_v2 = vcombine.low %v576_v60, %v584_v61  ;;  %v1042_v9 = vmov 32   ;;  %vm222_vm1 = vcmask 1031168   ;;  %v1043_v7 = vmov 20  }
  0x1d   : > { %228 = vperm.xlu0 %933, %v1112_v0   ;;  %v1264_v11 = vcombine.low %v572_v4, %v580_v5  ;;  %vm235_vm2 = vcmask 900096   ;;  %v1046_v27 = vmov 34   ;;  %vm248_vm3 = vcmask 891904  }
  0x1e   : > { %v1047_v31 = vmov 35   ;;  %vm261_vm4 = vcmask 883712   ;;  %vm274_vm5 = vcmask 752640   ;;  %v1048_v47 = vmov 26  }
  0x1f   : > { %218 = vrot.lane.b32.xlu1 %v1133_v15, %s1013_s29  ;;  %vm287_vm6 = vcmask 744448   ;;  %vm300_vm7 = vcmask 736256  }
  0x21   : > { %934 = vset.pattern.permute.xlu0 %v1014_v19 }
  0x22   : > { %241 = vperm.xlu0 %934, %v1112_v0  }
  0x23   : > { %220 = vrot.lane.b32.xlu1 %v1137_v16, %s1013_s29 }
  0x26   : > { %935 = vset.pattern.permute.xlu0 %v1015_v20 }
  0x27   : > { %231 = vrot.lane.b32.xlu1 %v1133_v15, %s1016_s30  ;;  %254 = vperm.xlu0 %935, %v1112_v0  }
  0x2b   : > { %233 = vrot.lane.b32.xlu1 %v1137_v16, %s1016_s30  ;;  %936 = vset.pattern.permute.xlu0 %v1017_v21  ;;  %v1044_v21 = vmov 33  }
  0x2c   : > { %267 = vperm.xlu0 %936, %v1112_v0  }
  0x2f   : > { %244 = vrot.lane.b32.xlu1 %v1133_v15, %s1018_s3 }
  0x30   : > { %937 = vset.pattern.permute.xlu0 %v1019_v22 }
  0x31   : > { %280 = vperm.xlu0 %937, %v1112_v0  }
  0x33   : > { %246 = vrot.lane.b32.xlu1 %v1137_v16, %s1018_s3 }
  0x35   : > { %938 = vset.pattern.permute.xlu0 %v1020_v23  ;;  %v1045_v23 = vmov 25  }
  0x36   : > { %293 = vperm.xlu0 %938, %v1112_v0  }
  0x37   : > { %257 = vrot.lane.b32.xlu1 %v1133_v15, %s1021_s4 }
  0x3a   : > { %939 = vset.pattern.permute.xlu0 %v1022_v28 }
  0x3b   : > { %259 = vrot.lane.b32.xlu1 %v1137_v16, %s1021_s4  ;;  %330 = vperm.xlu0 %939, %v1112_v0  }
  0x3f   : > { %270 = vrot.lane.b32.xlu1 %v1133_v15, %s1023_s5  ;;  %344 = vrot.lane.b32.xlu0 %v1169_v29, %s1010_s28 }
  0x40   : > { %942 = vset.pattern.permute.xlu0 %v1024_v32 }
  0x43   : > { %272 = vrot.lane.b32.xlu1 %v1137_v16, %s1023_s5  ;;  %354 = vrot.lane.b32.xlu0 %v1177_v33, %s1013_s29 }
  0x47   : > { %283 = vrot.lane.b32.xlu1 %v1133_v15, %s1025_s6  ;;  %363 = vperm.xlu0 %942, %v1112_v0  }
  0x4b   : > { %285 = vrot.lane.b32.xlu1 %v1137_v16, %s1025_s6  ;;  %943 = vset.pattern.permute.xlu0 %v1026_v34 }
  0x4c   : > { %375 = vperm.xlu0 %943, %v1112_v0  }
  0x4f   : > { %296 = vrot.lane.b32.xlu1 %v1133_v15, %s1027_s7 }
  0x50   : > { %944 = vset.pattern.permute.xlu0 %v1028_v35 }
  0x51   : > { %387 = vperm.xlu0 %944, %v1112_v0  }
  0x53   : > { %298 = vrot.lane.b32.xlu1 %v1137_v16, %s1027_s7 }
  0x55   : > { %945 = vset.pattern.permute.xlu0 %v1029_v36 }
  0x56   : > { %399 = vperm.xlu0 %945, %v1112_v0  }
  0x57   : > { %338 = vperm.xlu1 %940, %v1112_v0  }
  0x5a   : > { %946 = vset.pattern.permute.xlu0 %v1030_v37 }
  0x5b   : > { %342 = vrot.lane.b32.xlu1 %v1177_v33, %s1010_s28  ;;  %411 = vperm.xlu0 %946, %v1112_v0  }
  0x5c   : > { %941 = vset.pattern.permute.xlu1 %v1031_v38 }
  0x5f   : > { %351 = vperm.xlu1 %941, %v1112_v0   ;;  %947 = vset.pattern.permute.xlu0 %v1032_v39 }
  0x60   : > { %423 = vperm.xlu0 %947, %v1112_v0  }
  0x63   : > { %356 = vrot.lane.b32.xlu1 %v1169_v29, %s1013_s29 }
  0x64   : > { %948 = vset.pattern.permute.xlu0 %v1033_v44  ;;  %949 = vset.pattern.permute.xlu1 %v1034_v45 }
  0x65   : > { %459 = vperm.xlu0 %948, %v1112_v0  }
  0x67   : > { %366 = vrot.lane.b32.xlu1 %v1177_v33, %s1016_s30 }
  0x69   : > { %473 = vrot.lane.b32.xlu0 %v1208_v46, %s1010_s28 }
  0x6a   : > { %951 = vset.pattern.permute.xlu0 %v1035_v49 }
  0x6b   : > { %368 = vrot.lane.b32.xlu1 %v1169_v29, %s1016_s30 }
  0x6d   : > { %483 = vrot.lane.b32.xlu0 %v1218_v50, %s1013_s29 }
  0x6f   : > { %378 = vrot.lane.b32.xlu1 %v1177_v33, %s1018_s3 }
  0x71   : > { %492 = vperm.xlu0 %951, %v1112_v0  }
  0x73   : > { %380 = vrot.lane.b32.xlu1 %v1169_v29, %s1018_s3 }
  0x75   : > { %952 = vset.pattern.permute.xlu0 %v1036_v51 }
  0x76   : > { %504 = vperm.xlu0 %952, %v1112_v0  }
  0x77   : > { %390 = vrot.lane.b32.xlu1 %v1177_v33, %s1021_s4 }
  0x7a   : > { %953 = vset.pattern.permute.xlu0 %v1037_v52 }
  0x7b   : > { %392 = vrot.lane.b32.xlu1 %v1169_v29, %s1021_s4  ;;  %516 = vperm.xlu0 %953, %v1112_v0  }
  0x7f   : > { %402 = vrot.lane.b32.xlu1 %v1177_v33, %s1023_s5  ;;  %954 = vset.pattern.permute.xlu0 %v1038_v53 }
  0x80   : > { %528 = vperm.xlu0 %954, %v1112_v0  }
  0x83   : > { %404 = vrot.lane.b32.xlu1 %v1169_v29, %s1023_s5 }
  0x84   : > { %531 = vrot.lane.b32.xlu0 %v1218_v50, %s1023_s5 }
  0x85   : > { %957 = vset.pattern.permute.xlu0 %v1039_v54 }
  0x87   : > { %414 = vrot.lane.b32.xlu1 %v1177_v33, %s1025_s6 }
  0x88   : > { %588 = vperm.xlu0 %957, %v1112_v0  }
  0x8b   : > { %416 = vrot.lane.b32.xlu1 %v1169_v29, %s1025_s6 }
  0x8c   : > { %958 = vset.pattern.permute.xlu0 %v1040_v55 }
  0x8d   : > { %v202_v56 = vpop.permute.xlu1 %201  ;;  %v163_v57 = vpop.permute.xlu0 %162  ;;  %596 = vperm.xlu0 %958, %v1112_v0  }
  0x8f   : > { %426 = vrot.lane.b32.xlu1 %v1177_v33, %s1027_s7 }
  0x91   : > { %v206_v62 = vpop.permute.xlu1 %205  ;;  %959 = vset.pattern.permute.xlu0 %v1041_v63 }
  0x92   : > { %v194_v1 = vpop.permute.xlu0 %193  ;;  %609 = vperm.xlu0 %959, %v1112_v0  }
  0x93   : > { %428 = vrot.lane.b32.xlu1 %v1169_v29, %s1027_s7  ;;  %v198_v3 = vmul.f32 %v1133_v15, %v194_v1 }
  0x95   : > { %v199_v6 = vadd.f32 %v198_v3, %v163_v57  ;;  %v208_v8 = vpop.permute.xlu1 %207 }
  0x96   : > { %602 = vrot.lane.b32.xlu0 %v1253_v2, %s1010_s28  ;;  %v210_v10 = vsel %vm209_vm0, %v206_v62, %v208_v8 }
  0x97   : > { %467 = vperm.xlu1 %949, %v1112_v0   ;;  %962 = vset.pattern.permute.xlu0 %v1042_v9  ;;  %v212_v13 = vmul.f32 %v210_v10, %v202_v56  ;;  %v216_v14 = vpop.permute.xlu0 %215  ;;  %v1049_v56 = vmov 30  }
  0x99   : > { %v219_v12 = vpop.permute.xlu1 %218  ;;  %v213_v17 = vadd.f32 %v212_v13, %v199_v6 }
  0x9a   : > { %612 = vrot.lane.b32.xlu0 %v1264_v11, %s1013_s29 }
  0x9b   : > { %471 = vrot.lane.b32.xlu1 %v1218_v50, %s1010_s28 }
  0x9c   : > { %950 = vset.pattern.permute.xlu1 %v1043_v7  ;;  %v229_v22 = vpop.permute.xlu0 %228 }
  0x9d   : > { %v221_v15 = vpop.permute.xlu1 %220 }
  0x9e   : > { %v223_v16 = vsel %vm222_vm1, %v219_v12, %v221_v15  ;;  %645 = vperm.xlu0 %962, %v1112_v0   ;;  %v1050_v15 = vmov 31  }
  0x9f   : > { %v225_v18 = vmul.f32 %v223_v16, %v216_v14  ;;  %480 = vperm.xlu1 %950, %v1112_v0  }
  0xa1   : > { %v226_v19 = vadd.f32 %v225_v18, %v213_v17  ;;  %v232_v20 = vpop.permute.xlu1 %231  ;;  %v242_v30 = vpop.permute.xlu0 %241 }
  0xa2   : > { %963 = vset.pattern.permute.xlu0 %v1044_v21 }
  0xa3   : > { %485 = vrot.lane.b32.xlu1 %v1208_v46, %s1013_s29  ;;  %657 = vperm.xlu0 %963, %v1112_v0  }
  0xa4   : > { %955 = vset.pattern.permute.xlu1 %v1045_v23 }
  0xa5   : > { %v234_v24 = vpop.permute.xlu1 %233 }
  0xa6   : > { %v236_v25 = vsel %vm235_vm2, %v232_v20, %v234_v24  ;;  %v255_v38 = vpop.permute.xlu0 %254 }
  0xa7   : > { %v238_v26 = vmul.f32 %v236_v25, %v229_v22  ;;  %495 = vrot.lane.b32.xlu1 %v1218_v50, %s1016_s30  ;;  %964 = vset.pattern.permute.xlu0 %v1046_v27 }
  0xa8   : > { %669 = vperm.xlu0 %964, %v1112_v0  }
  0xa9   : > { %v239_v28 = vadd.f32 %v238_v26, %v226_v19  ;;  %v245_v29 = vpop.permute.xlu1 %244 }
  0xab   : > { %497 = vrot.lane.b32.xlu1 %v1208_v46, %s1016_s30  ;;  %v268_v48 = vpop.permute.xlu0 %267 }
  0xac   : > { %965 = vset.pattern.permute.xlu0 %v1047_v31 }
  0xad   : > { %v247_v32 = vpop.permute.xlu1 %246  ;;  %681 = vperm.xlu0 %965, %v1112_v0  }
  0xae   : > { %v249_v34 = vsel %vm248_vm3, %v245_v29, %v247_v32 }
  0xaf   : > { %v251_v35 = vmul.f32 %v249_v34, %v242_v30  ;;  %507 = vrot.lane.b32.xlu1 %v1218_v50, %s1018_s3 }
  0xb0   : > { %v281_v52 = vpop.permute.xlu0 %280 }
  0xb1   : > { %v252_v36 = vadd.f32 %v251_v35, %v239_v28  ;;  %v258_v37 = vpop.permute.xlu1 %257  ;;  %672 = vrot.lane.b32.xlu0 %v1264_v11, %s1025_s6 }
  0xb3   : > { %509 = vrot.lane.b32.xlu1 %v1208_v46, %s1018_s3 }
  0xb5   : > { %v260_v39 = vpop.permute.xlu1 %259  ;;  %684 = vrot.lane.b32.xlu0 %v1264_v11, %s1027_s7  ;;  %v294_v60 = vpop.permute.xlu0 %293 }
  0xb6   : > { %v262_v40 = vsel %vm261_vm4, %v258_v37, %v260_v39 }
  0xb7   : > { %v264_v41 = vmul.f32 %v262_v40, %v255_v38  ;;  %519 = vrot.lane.b32.xlu1 %v1218_v50, %s1021_s4 }
  0xb9   : > { %v265_v42 = vadd.f32 %v264_v41, %v252_v36  ;;  %v271_v43 = vpop.permute.xlu1 %270 }
  0xba   : > { %v331_v3 = vpop.permute.xlu0 %330 }
  0xbb   : > { %521 = vrot.lane.b32.xlu1 %v1208_v46, %s1021_s4  ;;  %v335_v5 = vmul.f32 %v1177_v33, %v331_v3 }
  0xbd   : > { %v273_v44 = vpop.permute.xlu1 %272 }
  0xbe   : > { %v275_v51 = vsel %vm274_vm5, %v271_v43, %v273_v44  ;;  %v345_v6 = vpop.permute.xlu0 %344 }
  0xbf   : > { %540 = vperm.xlu1 %955, %v1112_v0   ;;  %v277_v54 = vmul.f32 %v275_v51, %v268_v48 }
  0xc1   : > { %v284_v45 = vpop.permute.xlu1 %283  ;;  %v278_v58 = vadd.f32 %v277_v54, %v265_v42 }
  0xc2   : > { %v355_v14 = vpop.permute.xlu0 %354 }
  0xc3   : > { %956 = vset.pattern.permute.xlu1 %v1048_v47 }
  0xc4   : > { %552 = vperm.xlu1 %956, %v1112_v0  }
  0xc5   : > { %v286_v49 = vpop.permute.xlu1 %285 }
  0xc6   : > { %v288_v53 = vsel %vm287_vm6, %v284_v45, %v286_v49  ;;  %v364_v19 = vpop.permute.xlu0 %363 }
  0xc7   : > { %v290_v57 = vmul.f32 %v288_v53, %v281_v52 }
  0xc8   : > { %533 = vrot.lane.b32.xlu1 %v1208_v46, %s1023_s5 }
  0xc9   : > { %v297_v55 = vpop.permute.xlu1 %296  ;;  %960 = vset.pattern.permute.xlu1 %v1049_v56  ;;  %v291_v62 = vadd.f32 %v290_v57, %v278_v58 }
  0xcb   : > { %v376_v25 = vpop.permute.xlu0 %375 }
  0xcc   : > { %543 = vrot.lane.b32.xlu1 %v1218_v50, %s1025_s6 }
  0xcd   : > { %v299_v59 = vpop.permute.xlu1 %298 }
  0xce   : > { %v301_v61 = vsel %vm300_vm7, %v297_v55, %v299_v59 }
  0xcf   : > { %v303_v63 = vmul.f32 %v301_v61, %v294_v60 }
  0xd0   : > { %545 = vrot.lane.b32.xlu1 %v1208_v46, %s1025_s6  ;;  %v388_v30 = vpop.permute.xlu0 %387 }
  0xd1   : > { %v304_v1 = vadd.f32 %v303_v63, %v291_v62 }
  0xd3   : > { %v336_v10 = vadd.f32 %v335_v5, %v304_v1 }
  0xd4   : > { %555 = vrot.lane.b32.xlu1 %v1218_v50, %s1027_s7 }
  0xd5   : > { %v400_v37 = vpop.permute.xlu0 %399 }
  0xd6   : > { %v339_v4 = vpop.permute.xlu1 %338 }
  0xd8   : > { %557 = vrot.lane.b32.xlu1 %v1208_v46, %s1027_s7 }
  0xda   : > { %v343_v8 = vpop.permute.xlu1 %342  ;;  %v412_v43 = vpop.permute.xlu0 %411 }
  0xdb   : > { %v346_v9 = vsel %vm209_vm0, %v343_v8, %v345_v6 }
  0xdc   : > { %v348_v12 = vmul.f32 %v346_v9, %v339_v4  ;;  %621 = vperm.xlu1 %960, %v1112_v0  }
  0xde   : > { %v349_v13 = vadd.f32 %v348_v12, %v336_v10  ;;  %v352_v7 = vpop.permute.xlu1 %351 }
  0xdf   : > { %v424_v48 = vpop.permute.xlu0 %423 }
  0xe0   : > { %600 = vrot.lane.b32.xlu1 %v1264_v11, %s1010_s28 }
  0xe1   : > { %961 = vset.pattern.permute.xlu1 %v1050_v15 }
  0xe2   : > { %v357_v33 = vpop.permute.xlu1 %356 }
  0xe3   : > { %v358_v16 = vsel %vm222_vm1, %v355_v14, %v357_v33 }
  0xe4   : > { %v360_v46 = vmul.f32 %v358_v16, %v352_v7  ;;  %633 = vperm.xlu1 %961, %v1112_v0   ;;  %v460_v53 = vpop.permute.xlu0 %459 }
  0xe5   : > { %v464_v58 = vmul.f32 %v1218_v50, %v460_v53 }
  0xe6   : > { %v367_v17 = vpop.permute.xlu1 %366  ;;  %v361_v18 = vadd.f32 %v360_v46, %v349_v13 }
  0xe8   : > { %614 = vrot.lane.b32.xlu1 %v1253_v2, %s1013_s29  ;;  %v474_v59 = vpop.permute.xlu0 %473 }
  0xea   : > { %v369_v20 = vpop.permute.xlu1 %368 }
  0xeb   : > { %v370_v21 = vsel %vm235_vm2, %v367_v17, %v369_v20 }
  0xec   : > { %v372_v22 = vmul.f32 %v370_v21, %v364_v19  ;;  %624 = vrot.lane.b32.xlu1 %v1264_v11, %s1016_s30  ;;  %v484_v4 = vpop.permute.xlu0 %483 }
  0xee   : > { %v373_v23 = vadd.f32 %v372_v22, %v361_v18  ;;  %v379_v24 = vpop.permute.xlu1 %378 }
  0xf0   : > { %626 = vrot.lane.b32.xlu1 %v1253_v2, %s1016_s30  ;;  %v493_v10 = vpop.permute.xlu0 %492 }
  0xf2   : > { %v381_v0 = vpop.permute.xlu1 %380 }
  0xf3   : > { %v382_v26 = vsel %vm248_vm3, %v379_v24, %v381_v0 }
  0xf4   : > { %v384_v27 = vmul.f32 %v382_v26, %v376_v25  ;;  %636 = vrot.lane.b32.xlu1 %v1264_v11, %s1018_s3 }
  0xf5   : > { %v505_v15 = vpop.permute.xlu0 %504 }
  0xf6   : > { %v385_v28 = vadd.f32 %v384_v27, %v373_v23  ;;  %v391_v29 = vpop.permute.xlu1 %390 }
  0xf8   : > { %638 = vrot.lane.b32.xlu1 %v1253_v2, %s1018_s3 }
  0xfa   : > { %v393_v31 = vpop.permute.xlu1 %392  ;;  %v517_v19 = vpop.permute.xlu0 %516 }
  0xfb   : > { %v394_v32 = vsel %vm261_vm4, %v391_v29, %v393_v31 }
  0xfc   : > { %v396_v34 = vmul.f32 %v394_v32, %v388_v30  ;;  %648 = vrot.lane.b32.xlu1 %v1264_v11, %s1021_s4 }
  0xfe   : > { %v397_v35 = vadd.f32 %v396_v34, %v385_v28  ;;  %v403_v36 = vpop.permute.xlu1 %402 }
  0xff   : > { %v529_v26 = vpop.permute.xlu0 %528 }
 0x100   : > { %650 = vrot.lane.b32.xlu1 %v1253_v2, %s1021_s4 }
 0x102   : > { %v405_v38 = vpop.permute.xlu1 %404 }
 0x103   : > { %v406_v39 = vsel %vm274_vm5, %v403_v36, %v405_v38  ;;  %v532_v29 = vpop.permute.xlu0 %531 }
 0x104   : > { %v408_v40 = vmul.f32 %v406_v39, %v400_v37  ;;  %660 = vrot.lane.b32.xlu1 %v1264_v11, %s1023_s5 }
 0x106   : > { %v409_v41 = vadd.f32 %v408_v40, %v397_v35  ;;  %v415_v42 = vpop.permute.xlu1 %414 }
 0x107   : > { %v589_v31 = vpop.permute.xlu0 %588 }
 0x108   : > { %662 = vrot.lane.b32.xlu1 %v1253_v2, %s1023_s5 }
 0x10a   : > { %v417_v44 = vpop.permute.xlu1 %416 }
 0x10b   : > { %v418_v45 = vsel %vm287_vm6, %v415_v42, %v417_v44 }
 0x10c   : > { %v420_v47 = vmul.f32 %v418_v45, %v412_v43  ;;  %674 = vrot.lane.b32.xlu1 %v1253_v2, %s1025_s6  ;;  %v597_v34 = vpop.permute.xlu0 %596 }
 0x10e   : > { %v421_v49 = vadd.f32 %v420_v47, %v409_v41  ;;  %v427_v51 = vpop.permute.xlu1 %426 }
 0x110   : > { %686 = vrot.lane.b32.xlu1 %v1253_v2, %s1027_s7 }
 0x111   : > { %v610_v37 = vpop.permute.xlu0 %609 }
 0x112   : > { %v429_v52 = vpop.permute.xlu1 %428 }
 0x113   : > { %v430_v54 = vsel %vm300_vm7, %v427_v51, %v429_v52 }
 0x114   : > { %v432_v55 = vmul.f32 %v430_v54, %v424_v48 }
 0x115   : > { %v603_v39 = vpop.permute.xlu0 %602 }
 0x116   : > { %v433_v56 = vadd.f32 %v432_v55, %v421_v49  ;;  %v468_v57 = vpop.permute.xlu1 %467 }
 0x118   : > { %v465_v62 = vadd.f32 %v464_v58, %v433_v56 }
 0x119   : > { %v613_v41 = vpop.permute.xlu0 %612 }
 0x11a   : > { %v472_v60 = vpop.permute.xlu1 %471 }
 0x11b   : > { %v475_v61 = vsel %vm209_vm0, %v472_v60, %v474_v59 }
 0x11c   : > { %v477_v63 = vmul.f32 %v475_v61, %v468_v57  ;;  %v593_v61 = vmul.f32 %v1264_v11, %v589_v31 }
 0x11d   : > { %v646_v44 = vpop.permute.xlu0 %645 }
 0x11e   : > { %v478_v1 = vadd.f32 %v477_v63, %v465_v62  ;;  %v481_v3 = vpop.permute.xlu1 %480 }
 0x122   : > { %v486_v5 = vpop.permute.xlu1 %485  ;;  %v658_v48 = vpop.permute.xlu0 %657 }
 0x123   : > { %v487_v2 = vsel %vm222_vm1, %v484_v4, %v486_v5 }
 0x124   : > { %v489_v6 = vmul.f32 %v487_v2, %v481_v3 }
 0x126   : > { %v496_v8 = vpop.permute.xlu1 %495  ;;  %v490_v9 = vadd.f32 %v489_v6, %v478_v1 }
 0x127   : > { %v670_v58 = vpop.permute.xlu0 %669 }
 0x12a   : > { %v498_v12 = vpop.permute.xlu1 %497 }
 0x12b   : > { %v499_v13 = vsel %vm235_vm2, %v496_v8, %v498_v12 }
 0x12c   : > { %v501_v50 = vmul.f32 %v499_v13, %v493_v10  ;;  %v682_v4 = vpop.permute.xlu0 %681 }
 0x12e   : > { %v502_v7 = vadd.f32 %v501_v50, %v490_v9  ;;  %v508_v14 = vpop.permute.xlu1 %507 }
 0x132   : > { %v510_v33 = vpop.permute.xlu1 %509 }
 0x133   : > { %v511_v16 = vsel %vm248_vm3, %v508_v14, %v510_v33  ;;  %v673_v14 = vpop.permute.xlu0 %672 }
 0x134   : > { %v513_v46 = vmul.f32 %v511_v16, %v505_v15 }
 0x136   : > { %v514_v17 = vadd.f32 %v513_v46, %v502_v7  ;;  %v520_v18 = vpop.permute.xlu1 %519 }
 0x13a   : > { %v522_v20 = vpop.permute.xlu1 %521 }
 0x13b   : > { %v523_v21 = vsel %vm261_vm4, %v520_v18, %v522_v20 }
 0x13c   : > { %v525_v22 = vmul.f32 %v523_v21, %v517_v19 }
 0x13e   : > { %v526_v23 = vadd.f32 %v525_v22, %v514_v17  ;;  %v541_v24 = vpop.permute.xlu1 %540  ;;  %v685_v22 = vpop.permute.xlu0 %684 }
 0x143   : > { %v553_v25 = vpop.permute.xlu1 %552 }
 0x147   : > { %v534_v0 = vpop.permute.xlu1 %533 }
 0x148   : > { %v535_v47 = vsel %vm274_vm5, %v532_v29, %v534_v0 }
 0x149   : > { %v537_v51 = vmul.f32 %v535_v47, %v529_v26 }
 0x14b   : > { %v544_v27 = vpop.permute.xlu1 %543  ;;  %v538_v55 = vadd.f32 %v537_v51, %v526_v23 }
 0x14f   : > { %v546_v28 = vpop.permute.xlu1 %545 }
 0x150   : > { %v547_v49 = vsel %vm287_vm6, %v544_v27, %v546_v28 }
 0x151   : > { %v549_v54 = vmul.f32 %v547_v49, %v541_v24 }
 0x153   : > { %v556_v30 = vpop.permute.xlu1 %555  ;;  %v550_v59 = vadd.f32 %v549_v54, %v538_v55 }
 0x157   : > { %v558_v32 = vpop.permute.xlu1 %557 }
 0x158   : > { %v559_v53 = vsel %vm300_vm7, %v556_v30, %v558_v32 }
 0x159   : > { %v561_v56 = vmul.f32 %v559_v53, %v553_v25 }
 0x15b   : > { %v622_v35 = vpop.permute.xlu1 %621  ;;  %v562_v62 = vadd.f32 %v561_v56, %v550_v59 }
 0x15d   : > { %v594_v2 = vadd.f32 %v593_v61, %v562_v62 }
 0x15f   : > { %v601_v36 = vpop.permute.xlu1 %600 }
 0x160   : > { %v604_v60 = vsel %vm209_vm0, %v601_v36, %v603_v39 }
 0x161   : > { %v606_v3 = vmul.f32 %v604_v60, %v597_v34 }
 0x163   : > { %v634_v38 = vpop.permute.xlu1 %633  ;;  %v607_v10 = vadd.f32 %v606_v3, %v594_v2 }
 0x167   : > { %v615_v40 = vpop.permute.xlu1 %614 }
 0x168   : > { %v616_v1 = vsel %vm222_vm1, %v613_v41, %v615_v40 }
 0x169   : > { %v618_v6 = vmul.f32 %v616_v1, %v610_v37 }
 0x16b   : > { %v625_v42 = vpop.permute.xlu1 %624  ;;  %v619_v50 = vadd.f32 %v618_v6, %v607_v10 }
 0x16f   : > { %v627_v43 = vpop.permute.xlu1 %626 }
 0x170   : > { %v628_v5 = vsel %vm235_vm2, %v625_v42, %v627_v43 }
 0x171   : > { %v630_v12 = vmul.f32 %v628_v5, %v622_v35 }
 0x173   : > { %v637_v45 = vpop.permute.xlu1 %636  ;;  %v631_v33 = vadd.f32 %v630_v12, %v619_v50 }
 0x177   : > { %v639_v52 = vpop.permute.xlu1 %638 }
 0x178   : > { %v640_v9 = vsel %vm248_vm3, %v637_v45, %v639_v52 }
 0x179   : > { %v642_v11 = vmul.f32 %v640_v9, %v634_v38 }
 0x17b   : > { %v649_v57 = vpop.permute.xlu1 %648  ;;  %v643_v46 = vadd.f32 %v642_v11, %v631_v33 }
 0x17f   : > { %v651_v63 = vpop.permute.xlu1 %650 }
 0x180   : > { %v652_v13 = vsel %vm261_vm4, %v649_v57, %v651_v63 }
 0x181   : > { %v654_v16 = vmul.f32 %v652_v13, %v646_v44 }
 0x183   : > { %v661_v8 = vpop.permute.xlu1 %660  ;;  %v655_v20 = vadd.f32 %v654_v16, %v643_v46 }
 0x187   : > { %v663_v7 = vpop.permute.xlu1 %662 }
 0x188   : > { %v664_v15 = vsel %vm274_vm5, %v661_v8, %v663_v7 }
 0x189   : > { %v666_v17 = vmul.f32 %v664_v15, %v658_v48 }
 0x18b   : > { %v675_v18 = vpop.permute.xlu1 %674  ;;  %v667_v23 = vadd.f32 %v666_v17, %v655_v20 }
 0x18c   : > { %v676_v19 = vsel %vm287_vm6, %v673_v14, %v675_v18 }
 0x18d   : > { %v678_v21 = vmul.f32 %v676_v19, %v670_v58 }
 0x18f   : > { %v687_v24 = vpop.permute.xlu1 %686  ;;  %v679_v0 = vadd.f32 %v678_v21, %v667_v23  ;;  %701 = sbr.rel (!%p1098_p3) target bundleno = 414 (0x19e), region = 32 }
 0x190   : > { %v688_v25 = vsel %vm300_vm7, %v685_v22, %v687_v24 }
 0x191   : > { %v690_v26 = vmul.f32 %v688_v25, %v682_v4 }
 0x193   : > { %v691_v27 = vadd.f32 %v690_v26, %v679_v0 }
 0x195   : > { %692 = vst [vmem:[%s149_s16] sm:$0xff] %v691_v27  }
 0x19c   : > { %v722_v28 = vld [vmem:[%s149_s16] sm:$0xf]  ;;  %v724_v29 = vld [vmem:[%s149_s16 + $0x4] sm:$0xf] }
 0x19d   : > { %723 = vst [vmem:[%s706_s21] sm:$0xf] %v722_v28  ;;  %725 = vst [vmem:[%s706_s21 + $0xc] sm:$0xf] %v724_v29 }
 0x19e PF: > { %s12_s13 = sadd.s32 1, %s1004_s13   ;;  %s1391_s9 = smov %s992_s10 }
 0x19f   : > { %p9_p8 = scmp.ge.s32.totalorder %s12_s13, 5   ;;  %s1392_s10 = smov %s1107_s19 }
 0x1a0   : > { %s1393_s11 = smov %s1000_s12  ;;  %s1394_s12 = smov %s1396_s15 }
 0x1a1   :  { %11 = sbr.rel (!%p9_p8) target bundleno = 3 (0x3), region = 108 }

</bundles_post_ra>
